<compile_context>
chip_gen: v5e
topology: v5e:2x2
jax: 0.10.0
libtpu: 0.0.40
codegen_flags: <defaults>
</compile_context>

<pallas_src>
import jax
import jax.numpy as jnp
import numpy as np
from jax.experimental import pallas as pl
from jax.experimental.pallas import tpu as pltpu

EMBED = 32          # "input" arg of EncoderBlock
HEADS = 4
HEAD_DIM = EMBED // HEADS
FFN_HIDDEN = 128
LN_EPS = 1e-5

assert EMBED <= 128 and FFN_HIDDEN <= 128   # packed-vector rows fit in 128 lanes


def _layernorm(y, g, b):
    # var = E[x^2] - E[x]^2 (saves a full-width subtract vs. the two-pass form).
    mu = jnp.mean(y, axis=-1, keepdims=True)
    ms = jnp.mean(y * y, axis=-1, keepdims=True)
    var = ms - mu * mu
    return (y - mu) * jax.lax.rsqrt(var + LN_EPS) * g + b


def encoder_block_kernel(x_ref, wq_ref, wk_ref, wv_ref, wo_ref, w1_ref, w2_ref,
                         vecs_ref, o_ref):
    """One grid step = one batch tile; all linears run on the (bt*S, E) token matrix."""
    bt, S, E = x_ref.shape
    rows = bt * S
    H, D = HEADS, HEAD_DIM

    x3 = x_ref[...]                        # (bt, S, E) f32
    x2d = x3.reshape(rows, E)              # leading-dim collapse (layout no-op)
    x_bf = x2d.astype(jnp.bfloat16)        # MXU operand only; f32 copy kept for residual

    # Packed bias / LayerNorm parameters: one (16, 128) lane-dense block.
    vecs = vecs_ref[...]
    b_q   = vecs[0:1, 0:E]                 # 1/sqrt(D) already folded in
    b_k   = vecs[1:2, 0:E]
    b_v   = vecs[2:3, 0:E]
    b_out = vecs[3:4, 0:E]
    b1    = vecs[4:5, 0:FFN_HIDDEN]
    b2    = vecs[5:6, 0:E]
    g1    = vecs[6:7, 0:E]
    beta1 = vecs[7:8, 0:E]
    g2    = vecs[8:9, 0:E]
    beta2 = vecs[9:10, 0:E]

    # ---- QKV projections: three lane-aligned matmuls (bf16 operands, f32 accum) ----
    q = jnp.dot(x_bf, wq_ref[...], preferred_element_type=jnp.float32) + b_q
    k = jnp.dot(x_bf, wk_ref[...], preferred_element_type=jnp.float32) + b_k
    v = jnp.dot(x_bf, wv_ref[...], preferred_element_type=jnp.float32) + b_v
    q3 = q.reshape(bt, S, E)
    k3 = k.reshape(bt, S, E)
    v3 = v.reshape(bt, S, E)

    # ---- multi-head attention without lane-offset slices ----
    # Constant 0/1 lane masks select each head's lanes; masked q / v are stacked along
    # the leading (batch) axis so scores, softmax and context are single batched ops.
    lane = jax.lax.broadcasted_iota(jnp.int32, (1, 1, E), 2)
    qm_parts, vm_parts = [], []
    for h in range(H):
        m_h = ((lane >= h * D) & (lane < (h + 1) * D)).astype(jnp.float32)
        qm_parts.append(q3 * m_h)
        vm_parts.append(v3 * m_h)
    qm = jnp.concatenate(qm_parts, axis=0).astype(jnp.bfloat16)   # (H*bt, S, E)
    vm = jnp.concatenate(vm_parts, axis=0).astype(jnp.bfloat16)   # (H*bt, S, E)
    kb = jnp.concatenate([k3] * H, axis=0).astype(jnp.bfloat16)   # (H*bt, S, E)

    # scores for all heads at once (masked q makes the full-E contraction per-head exact)
    s = jnp.einsum('bqe,bke->bqk', qm, kb,
                   preferred_element_type=jnp.float32)            # (H*bt, S, S)
    s = s - jnp.max(s, axis=-1, keepdims=True)
    p = jnp.exp(s)
    denom = jnp.sum(p, axis=-1, keepdims=True)
    r = pl.reciprocal(denom, approx=True)
    r = r * (2.0 - denom * r)              # one Newton step -> near-exact f32 reciprocal
    p = p * r

    # per-head contexts already live in their final (concatenated) lanes via masked v
    ctx = jnp.einsum('bqk,bke->bqe', p.astype(jnp.bfloat16), vm,
                     preferred_element_type=jnp.float32)          # (H*bt, S, E)
    ctx_full = ctx[0:bt]
    for h in range(1, H):
        ctx_full = ctx_full + ctx[h * bt:(h + 1) * bt]            # (bt, S, E)

    # single out-projection matmul over the full width
    attn2d = jnp.dot(ctx_full.reshape(rows, E).astype(jnp.bfloat16), wo_ref[...],
                     preferred_element_type=jnp.float32) + b_out

    # ---- residual + norm1 ----
    x1 = _layernorm(attn2d + x2d, g1, beta1)

    # ---- FFN: Linear(E,128) -> ReLU -> Linear(128,E) ----
    h1 = jnp.dot(x1.astype(jnp.bfloat16), w1_ref[...],
                 preferred_element_type=jnp.float32) + b1
    h1 = jnp.maximum(h1, 0.0)
    h2 = jnp.dot(h1.astype(jnp.bfloat16), w2_ref[...],
                 preferred_element_type=jnp.float32) + b2

    # ---- residual + norm2 ----
    x2 = _layernorm(h2 + x1, g2, beta2)
    o_ref[...] = x2.reshape(bt, S, E)


def _pack_vectors(rows):
    """Pack the ten (1, N) bias/LN vectors into one (16, 128) lane-dense block."""
    vecs = jnp.zeros((16, 128), jnp.float32)
    for i, r in enumerate(rows):
        r = r.reshape(-1)
        vecs = vecs.at[i, :r.shape[0]].set(r)
    return vecs


def _pick_batch_tile(B, S):
    """Aim for >=128 rows per grid step; shrink to a divisor of B."""
    bt = min(B, max(1, pl.cdiv(128, S)))
    while B % bt:
        bt -= 1
    return bt


def encoder_block(x_sbe, params, *, batch_tile=None):
    """x_sbe: (seq, batch, embed) float32, like the PyTorch module."""
    x = jnp.transpose(x_sbe, (1, 0, 2)).astype(jnp.float32)   # (B, S, E)
    B, S, E = x.shape
    assert E == EMBED

    bt = _pick_batch_tile(B, S) if batch_tile is None else batch_tile
    assert B % bt == 0
    grid = (B // bt,)
    # NOTE: when scaling batch_tile up (real batch sizes), keep 2*(in+out)*bt*S*E*4B plus
    # intermediates under the scoped VMEM limit (32 MiB default; 64 MiB physical on v7x).

    scale = 1.0 / (HEAD_DIM ** 0.5)
    w_in, b_in = params["w_in"], params["b_in"]
    # Split the in-projection into lane-aligned per-projection weights (trace-time slice)
    # and fold the attention scale into the Q path.  Ship MXU weights in bf16.
    w_q = (w_in[:, 0:E] * scale).astype(jnp.bfloat16)
    w_k = w_in[:, E:2 * E].astype(jnp.bfloat16)
    w_v = w_in[:, 2 * E:3 * E].astype(jnp.bfloat16)
    b_q = b_in[:, 0:E] * scale
    b_k = b_in[:, E:2 * E]
    b_v = b_in[:, 2 * E:3 * E]
    w_out = params["w_out"].astype(jnp.bfloat16)
    w1 = params["w1"].astype(jnp.bfloat16)
    w2 = params["w2"].astype(jnp.bfloat16)

    vecs = _pack_vectors([b_q, b_k, b_v, params["b_out"], params["b1"], params["b2"],
                          params["g1"], params["beta1"], params["g2"], params["beta2"]])

    def resident(shape):
        return pl.BlockSpec(shape, lambda i: (0, 0))

    out = pl.pallas_call(
        encoder_block_kernel,
        out_shape=jax.ShapeDtypeStruct((B, S, E), jnp.float32),
        grid=grid,
        in_specs=[pl.BlockSpec((bt, S, E), lambda i: (i, 0, 0)),
                  resident(w_q.shape), resident(w_k.shape), resident(w_v.shape),
                  resident(w_out.shape), resident(w1.shape), resident(w2.shape),
                  resident(vecs.shape)],
        out_specs=pl.BlockSpec((bt, S, E), lambda i: (i, 0, 0)),
        compiler_params=pltpu.CompilerParams(
            dimension_semantics=("parallel",)),   # batch tiles are independent
    )(x, w_q, w_k, w_v, w_out, w1, w2, vecs)

    return jnp.transpose(out, (1, 0, 2))                      # back to (S, B, E)


def init_params(key):
    """PyTorch-shaped params, pre-transposed to (in, out) for the kernel."""
    ks = jax.random.split(key, 8)
    scale = 0.1
    # nn.MultiheadAttention: in_proj_weight (3E, E), out_proj (E, E)
    in_proj_w = jax.random.normal(ks[0], (3 * EMBED, EMBED), jnp.float32) * scale
    in_proj_b = jax.random.normal(ks[1], (3 * EMBED,), jnp.float32) * scale
    out_proj_w = jax.random.normal(ks[2], (EMBED, EMBED), jnp.float32) * scale
    out_proj_b = jax.random.normal(ks[3], (EMBED,), jnp.float32) * scale
    # FFN linears: (out_features, in_features) in PyTorch
    w1 = jax.random.normal(ks[4], (FFN_HIDDEN, EMBED), jnp.float32) * scale
    b1 = jax.random.normal(ks[5], (FFN_HIDDEN,), jnp.float32) * scale
    w2 = jax.random.normal(ks[6], (EMBED, FFN_HIDDEN), jnp.float32) * scale
    b2 = jax.random.normal(ks[7], (EMBED,), jnp.float32) * scale
    # LayerNorm defaults: weight=1, bias=0
    return {
        "w_in": in_proj_w.T,                 # (E, 3E)
        "b_in": in_proj_b.reshape(1, -1),
        "w_out": out_proj_w.T,               # (E, E)
        "b_out": out_proj_b.reshape(1, -1),
        "w1": w1.T,                          # (E, 128)
        "b1": b1.reshape(1, -1),
        "w2": w2.T,                          # (128, E)
        "b2": b2.reshape(1, -1),
        "g1": jnp.ones((1, EMBED), jnp.float32),
        "beta1": jnp.zeros((1, EMBED), jnp.float32),
        "g2": jnp.ones((1, EMBED), jnp.float32),
        "beta2": jnp.zeros((1, EMBED), jnp.float32),
    }


def reference(x_sbe, p):
    """Pure-JAX f32 mirror of the PyTorch forward, for correctness check."""
    x = jnp.transpose(x_sbe, (1, 0, 2)).astype(jnp.float32)   # (B, S, E)
    B, S, E = x.shape
    qkv = x @ p["w_in"] + p["b_in"]
    q, k, v = qkv[..., :E], qkv[..., E:2 * E], qkv[..., 2 * E:]

    def split_heads(t):  # (B, S, E) -> (B, H, S, D)
        return t.reshape(B, S, HEADS, HEAD_DIM).transpose(0, 2, 1, 3)

    qh, kh, vh = split_heads(q), split_heads(k), split_heads(v)
    s = jnp.einsum("bhqd,bhkd->bhqk", qh, kh) / (HEAD_DIM ** 0.5)
    pmat = jax.nn.softmax(s, axis=-1)
    attn = jnp.einsum("bhqk,bhkd->bhqd", pmat, vh)
    attn = attn.transpose(0, 2, 1, 3).reshape(B, S, E)
    attn = attn @ p["w_out"] + p["b_out"]

    def ln(y, g, b):
        mu = jnp.mean(y, -1, keepdims=True)
        var = jnp.mean((y - mu) ** 2, -1, keepdims=True)
        return (y - mu) / jnp.sqrt(var + LN_EPS) * g + b

    x1 = ln(attn + x, p["g1"], p["beta1"])
    h = jax.nn.relu(x1 @ p["w1"] + p["b1"]) @ p["w2"] + p["b2"]
    x2 = ln(h + x1, p["g2"], p["beta2"])
    return jnp.transpose(x2, (1, 0, 2))


if __name__ == "__main__":
    key = jax.random.PRNGKey(0)
    k_x, k_p = jax.random.split(key)
    SEQ, BATCH = 8, 2
    x = jax.random.normal(k_x, (SEQ, BATCH, EMBED), jnp.float32)   # (seq, batch, embed)
    params = init_params(k_p)

    run = jax.jit(encoder_block)
    out = jax.block_until_ready(run(x, params))

    ref = jax.block_until_ready(reference(x, params))
    assert out.shape == (SEQ, BATCH, EMBED)
    # Tolerance accounts for bf16 MXU operands (accumulation stays f32, LayerNorm /
    # softmax math stays f32, reciprocal has a Newton refinement); real bugs are O(1).
    np.testing.assert_allclose(np.asarray(out), np.asarray(ref), rtol=2e-2, atol=2e-2)
    print("KERNEL_OK")
</pallas_src>

<mosaic_0001>
module attributes {stable_mosaic.version = 11 : i64} {
  func.func @encoder_block_kernel(%arg0: i32, %arg1: memref<2x8x32xf32, #tpu.memory_space<vmem>>, %arg2: memref<32x32xbf16, #tpu.memory_space<vmem>>, %arg3: memref<32x32xbf16, #tpu.memory_space<vmem>>, %arg4: memref<32x32xbf16, #tpu.memory_space<vmem>>, %arg5: memref<32x32xbf16, #tpu.memory_space<vmem>>, %arg6: memref<32x128xbf16, #tpu.memory_space<vmem>>, %arg7: memref<128x32xbf16, #tpu.memory_space<vmem>>, %arg8: memref<16x128xf32, #tpu.memory_space<vmem>>, %arg9: memref<2x8x32xf32, #tpu.memory_space<vmem>>) attributes {dimension_semantics = [#tpu.dimension_semantics<parallel>], iteration_bounds = array<i64: 1>, scalar_prefetch = 0 : i64, scratch_operands = 0 : i64, tpu.core_type = #tpu.core_type<tc>, window_params = [{transform_indices = @transform_0, window_bounds = array<i64: 2, 8, 32>}, {pipeline_mode = #tpu.pipeline_mode<synchronous>, transform_indices = @transform_1, window_bounds = array<i64: 32, 32>}, {pipeline_mode = #tpu.pipeline_mode<synchronous>, transform_indices = @transform_2, window_bounds = array<i64: 32, 32>}, {pipeline_mode = #tpu.pipeline_mode<synchronous>, transform_indices = @transform_3, window_bounds = array<i64: 32, 32>}, {pipeline_mode = #tpu.pipeline_mode<synchronous>, transform_indices = @transform_4, window_bounds = array<i64: 32, 32>}, {pipeline_mode = #tpu.pipeline_mode<synchronous>, transform_indices = @transform_5, window_bounds = array<i64: 32, 128>}, {pipeline_mode = #tpu.pipeline_mode<synchronous>, transform_indices = @transform_6, window_bounds = array<i64: 128, 32>}, {pipeline_mode = #tpu.pipeline_mode<synchronous>, transform_indices = @transform_7, window_bounds = array<i64: 16, 128>}, {transform_indices = @transform_8, window_bounds = array<i64: 2, 8, 32>}]} {
    %c0 = arith.constant 0 : index
    %c0_0 = arith.constant 0 : index
    %c0_1 = arith.constant 0 : index
    %0 = vector.load %arg1[%c0, %c0_0, %c0_1] : memref<2x8x32xf32, #tpu.memory_space<vmem>>, vector<2x8x32xf32>
    %1 = vector.shape_cast %0 : vector<2x8x32xf32> to vector<16x32xf32>
    %2 = arith.truncf %1 : vector<16x32xf32> to vector<16x32xbf16>
    %c0_2 = arith.constant 0 : index
    %c0_3 = arith.constant 0 : index
    %3 = vector.load %arg8[%c0_2, %c0_3] : memref<16x128xf32, #tpu.memory_space<vmem>>, vector<16x128xf32>
    %4 = vector.extract_strided_slice %3 {offsets = [0, 0], sizes = [1, 32], strides = [1, 1]} : vector<16x128xf32> to vector<1x32xf32>
    %5 = vector.extract_strided_slice %3 {offsets = [1, 0], sizes = [1, 32], strides = [1, 1]} : vector<16x128xf32> to vector<1x32xf32>
    %6 = vector.extract_strided_slice %3 {offsets = [2, 0], sizes = [1, 32], strides = [1, 1]} : vector<16x128xf32> to vector<1x32xf32>
    %7 = vector.extract_strided_slice %3 {offsets = [3, 0], sizes = [1, 32], strides = [1, 1]} : vector<16x128xf32> to vector<1x32xf32>
    %8 = vector.extract_strided_slice %3 {offsets = [4, 0], sizes = [1, 128], strides = [1, 1]} : vector<16x128xf32> to vector<1x128xf32>
    %9 = vector.extract_strided_slice %3 {offsets = [5, 0], sizes = [1, 32], strides = [1, 1]} : vector<16x128xf32> to vector<1x32xf32>
    %10 = vector.extract_strided_slice %3 {offsets = [6, 0], sizes = [1, 32], strides = [1, 1]} : vector<16x128xf32> to vector<1x32xf32>
    %11 = vector.extract_strided_slice %3 {offsets = [7, 0], sizes = [1, 32], strides = [1, 1]} : vector<16x128xf32> to vector<1x32xf32>
    %12 = vector.extract_strided_slice %3 {offsets = [8, 0], sizes = [1, 32], strides = [1, 1]} : vector<16x128xf32> to vector<1x32xf32>
    %13 = vector.extract_strided_slice %3 {offsets = [9, 0], sizes = [1, 32], strides = [1, 1]} : vector<16x128xf32> to vector<1x32xf32>
    %c0_4 = arith.constant 0 : index
    %c0_5 = arith.constant 0 : index
    %14 = vector.load %arg2[%c0_4, %c0_5] : memref<32x32xbf16, #tpu.memory_space<vmem>>, vector<32x32xbf16>
    %cst = arith.constant dense<0.000000e+00> : vector<16x32xf32>
    %15 = tpu.matmul %2, %14, %cst {dimension_numbers = #tpu.dot_dimension_numbers<[1], [0], [0], [1], [0, 0, 1, 1], [], []>} : vector<16x32xbf16>, vector<32x32xbf16>, vector<16x32xf32> -> vector<16x32xf32>
    %16 = vector.broadcast %4 : vector<1x32xf32> to vector<16x32xf32>
    %17 = arith.addf %15, %16 : vector<16x32xf32>
    %c0_6 = arith.constant 0 : index
    %c0_7 = arith.constant 0 : index
    %18 = vector.load %arg3[%c0_6, %c0_7] : memref<32x32xbf16, #tpu.memory_space<vmem>>, vector<32x32xbf16>
    %cst_8 = arith.constant dense<0.000000e+00> : vector<16x32xf32>
    %19 = tpu.matmul %2, %18, %cst_8 {dimension_numbers = #tpu.dot_dimension_numbers<[1], [0], [0], [1], [0, 0, 1, 1], [], []>} : vector<16x32xbf16>, vector<32x32xbf16>, vector<16x32xf32> -> vector<16x32xf32>
    %20 = vector.broadcast %5 : vector<1x32xf32> to vector<16x32xf32>
    %21 = arith.addf %19, %20 : vector<16x32xf32>
    %c0_9 = arith.constant 0 : index
    %c0_10 = arith.constant 0 : index
    %22 = vector.load %arg4[%c0_9, %c0_10] : memref<32x32xbf16, #tpu.memory_space<vmem>>, vector<32x32xbf16>
    %cst_11 = arith.constant dense<0.000000e+00> : vector<16x32xf32>
    %23 = tpu.matmul %2, %22, %cst_11 {dimension_numbers = #tpu.dot_dimension_numbers<[1], [0], [0], [1], [0, 0, 1, 1], [], []>} : vector<16x32xbf16>, vector<32x32xbf16>, vector<16x32xf32> -> vector<16x32xf32>
    %24 = vector.broadcast %6 : vector<1x32xf32> to vector<16x32xf32>
    %25 = arith.addf %23, %24 : vector<16x32xf32>
    %26 = vector.shape_cast %17 : vector<16x32xf32> to vector<2x8x32xf32>
    %27 = vector.shape_cast %21 : vector<16x32xf32> to vector<2x8x32xf32>
    %28 = vector.shape_cast %25 : vector<16x32xf32> to vector<2x8x32xf32>
    %29 = tpu.iota {dimensions = array<i32: 2>} : vector<1x1x32xi32>
    %c0_i32 = arith.constant 0 : i32
    %30 = vector.broadcast %c0_i32 : i32 to vector<1x1x32xi32>
    %31 = arith.cmpi sge, %29, %30 : vector<1x1x32xi32>
    %c8_i32 = arith.constant 8 : i32
    %32 = vector.broadcast %c8_i32 : i32 to vector<1x1x32xi32>
    %33 = arith.cmpi slt, %29, %32 : vector<1x1x32xi32>
    %34 = arith.andi %31, %33 : vector<1x1x32xi1>
    %35 = arith.extui %34 : vector<1x1x32xi1> to vector<1x1x32xi32>
    %36 = arith.sitofp %35 : vector<1x1x32xi32> to vector<1x1x32xf32>
    %37 = vector.broadcast %36 : vector<1x1x32xf32> to vector<2x8x32xf32>
    %38 = arith.mulf %26, %37 : vector<2x8x32xf32>
    %39 = vector.broadcast %36 : vector<1x1x32xf32> to vector<2x8x32xf32>
    %40 = arith.mulf %28, %39 : vector<2x8x32xf32>
    %c8_i32_12 = arith.constant 8 : i32
    %41 = vector.broadcast %c8_i32_12 : i32 to vector<1x1x32xi32>
    %42 = arith.cmpi sge, %29, %41 : vector<1x1x32xi32>
    %c16_i32 = arith.constant 16 : i32
    %43 = vector.broadcast %c16_i32 : i32 to vector<1x1x32xi32>
    %44 = arith.cmpi slt, %29, %43 : vector<1x1x32xi32>
    %45 = arith.andi %42, %44 : vector<1x1x32xi1>
    %46 = arith.extui %45 : vector<1x1x32xi1> to vector<1x1x32xi32>
    %47 = arith.sitofp %46 : vector<1x1x32xi32> to vector<1x1x32xf32>
    %48 = vector.broadcast %47 : vector<1x1x32xf32> to vector<2x8x32xf32>
    %49 = arith.mulf %26, %48 : vector<2x8x32xf32>
    %50 = vector.broadcast %47 : vector<1x1x32xf32> to vector<2x8x32xf32>
    %51 = arith.mulf %28, %50 : vector<2x8x32xf32>
    %c16_i32_13 = arith.constant 16 : i32
    %52 = vector.broadcast %c16_i32_13 : i32 to vector<1x1x32xi32>
    %53 = arith.cmpi sge, %29, %52 : vector<1x1x32xi32>
    %c24_i32 = arith.constant 24 : i32
    %54 = vector.broadcast %c24_i32 : i32 to vector<1x1x32xi32>
    %55 = arith.cmpi slt, %29, %54 : vector<1x1x32xi32>
    %56 = arith.andi %53, %55 : vector<1x1x32xi1>
    %57 = arith.extui %56 : vector<1x1x32xi1> to vector<1x1x32xi32>
    %58 = arith.sitofp %57 : vector<1x1x32xi32> to vector<1x1x32xf32>
    %59 = vector.broadcast %58 : vector<1x1x32xf32> to vector<2x8x32xf32>
    %60 = arith.mulf %26, %59 : vector<2x8x32xf32>
    %61 = vector.broadcast %58 : vector<1x1x32xf32> to vector<2x8x32xf32>
    %62 = arith.mulf %28, %61 : vector<2x8x32xf32>
    %c24_i32_14 = arith.constant 24 : i32
    %63 = vector.broadcast %c24_i32_14 : i32 to vector<1x1x32xi32>
    %64 = arith.cmpi sge, %29, %63 : vector<1x1x32xi32>
    %c32_i32 = arith.constant 32 : i32
    %65 = vector.broadcast %c32_i32 : i32 to vector<1x1x32xi32>
    %66 = arith.cmpi slt, %29, %65 : vector<1x1x32xi32>
    %67 = arith.andi %64, %66 : vector<1x1x32xi1>
    %68 = arith.extui %67 : vector<1x1x32xi1> to vector<1x1x32xi32>
    %69 = arith.sitofp %68 : vector<1x1x32xi32> to vector<1x1x32xf32>
    %70 = vector.broadcast %69 : vector<1x1x32xf32> to vector<2x8x32xf32>
    %71 = arith.mulf %26, %70 : vector<2x8x32xf32>
    %72 = vector.broadcast %69 : vector<1x1x32xf32> to vector<2x8x32xf32>
    %73 = arith.mulf %28, %72 : vector<2x8x32xf32>
    %74 = tpu.concatenate %38, %49, %60, %71 in 0 : vector<2x8x32xf32>, vector<2x8x32xf32>, vector<2x8x32xf32>, vector<2x8x32xf32> -> vector<8x8x32xf32>
    %75 = arith.truncf %74 : vector<8x8x32xf32> to vector<8x8x32xbf16>
    %76 = tpu.concatenate %40, %51, %62, %73 in 0 : vector<2x8x32xf32>, vector<2x8x32xf32>, vector<2x8x32xf32>, vector<2x8x32xf32> -> vector<8x8x32xf32>
    %77 = arith.truncf %76 : vector<8x8x32xf32> to vector<8x8x32xbf16>
    %78 = tpu.concatenate %27, %27, %27, %27 in 0 : vector<2x8x32xf32>, vector<2x8x32xf32>, vector<2x8x32xf32>, vector<2x8x32xf32> -> vector<8x8x32xf32>
    %79 = arith.truncf %78 : vector<8x8x32xf32> to vector<8x8x32xbf16>
    "tpu.trace_start"() <{level = 10 : i32, message = "bqe,bke->bqk"}> : () -> ()
    %cst_15 = arith.constant dense<0.000000e+00> : vector<8x8x8xf32>
    %80 = tpu.matmul %75, %79, %cst_15 {dimension_numbers = #tpu.dot_dimension_numbers<[2], [2], [1], [1], [0, 0, 0, 1, 1, 1], [0], [0]>} : vector<8x8x32xbf16>, vector<8x8x32xbf16>, vector<8x8x8xf32> -> vector<8x8x8xf32>
    "tpu.trace_stop"() : () -> ()
    %cst_16 = arith.constant dense<0xFF800000> : vector<8x8xf32>
    %81 = vector.multi_reduction <maximumf>, %80, %cst_16 [2] : vector<8x8x8xf32> to vector<8x8xf32>
    %82 = vector.shape_cast %81 : vector<8x8xf32> to vector<8x8x1xf32>
    %83 = vector.broadcast %82 : vector<8x8x1xf32> to vector<8x8x8xf32>
    %84 = arith.subf %80, %83 : vector<8x8x8xf32>
    %85 = math.exp %84 : vector<8x8x8xf32>
    %cst_17 = arith.constant dense<0.000000e+00> : vector<8x8xf32>
    %86 = vector.multi_reduction <add>, %85, %cst_17 [2] : vector<8x8x8xf32> to vector<8x8xf32>
    %87 = vector.shape_cast %86 : vector<8x8xf32> to vector<8x8x1xf32>
    %88 = tpu.reciprocal %87 {approx = true} : vector<8x8x1xf32> -> vector<8x8x1xf32>
    %89 = arith.mulf %87, %88 : vector<8x8x1xf32>
    %cst_18 = arith.constant 2.000000e+00 : f32
    %90 = vector.broadcast %cst_18 : f32 to vector<8x8x1xf32>
    %91 = arith.subf %90, %89 : vector<8x8x1xf32>
    %92 = arith.mulf %88, %91 : vector<8x8x1xf32>
    %93 = vector.broadcast %92 : vector<8x8x1xf32> to vector<8x8x8xf32>
    %94 = arith.mulf %85, %93 : vector<8x8x8xf32>
    %95 = arith.truncf %94 : vector<8x8x8xf32> to vector<8x8x8xbf16>
    "tpu.trace_start"() <{level = 10 : i32, message = "bqk,bke->bqe"}> : () -> ()
    %cst_19 = arith.constant dense<0.000000e+00> : vector<8x8x32xf32>
    %96 = tpu.matmul %95, %77, %cst_19 {dimension_numbers = #tpu.dot_dimension_numbers<[2], [1], [1], [2], [0, 0, 0, 1, 1, 2], [0], [0]>} : vector<8x8x8xbf16>, vector<8x8x32xbf16>, vector<8x8x32xf32> -> vector<8x8x32xf32>
    "tpu.trace_stop"() : () -> ()
    %97 = vector.extract_strided_slice %96 {offsets = [0, 0, 0], sizes = [2, 8, 32], strides = [1, 1, 1]} : vector<8x8x32xf32> to vector<2x8x32xf32>
    %98 = vector.extract_strided_slice %96 {offsets = [2, 0, 0], sizes = [2, 8, 32], strides = [1, 1, 1]} : vector<8x8x32xf32> to vector<2x8x32xf32>
    %99 = arith.addf %97, %98 : vector<2x8x32xf32>
    %100 = vector.extract_strided_slice %96 {offsets = [4, 0, 0], sizes = [2, 8, 32], strides = [1, 1, 1]} : vector<8x8x32xf32> to vector<2x8x32xf32>
    %101 = arith.addf %99, %100 : vector<2x8x32xf32>
    %102 = vector.extract_strided_slice %96 {offsets = [6, 0, 0], sizes = [2, 8, 32], strides = [1, 1, 1]} : vector<8x8x32xf32> to vector<2x8x32xf32>
    %103 = arith.addf %101, %102 : vector<2x8x32xf32>
    %104 = vector.shape_cast %103 : vector<2x8x32xf32> to vector<16x32xf32>
    %105 = arith.truncf %104 : vector<16x32xf32> to vector<16x32xbf16>
    %c0_20 = arith.constant 0 : index
    %c0_21 = arith.constant 0 : index
    %106 = vector.load %arg5[%c0_20, %c0_21] : memref<32x32xbf16, #tpu.memory_space<vmem>>, vector<32x32xbf16>
    %cst_22 = arith.constant dense<0.000000e+00> : vector<16x32xf32>
    %107 = tpu.matmul %105, %106, %cst_22 {dimension_numbers = #tpu.dot_dimension_numbers<[1], [0], [0], [1], [0, 0, 1, 1], [], []>} : vector<16x32xbf16>, vector<32x32xbf16>, vector<16x32xf32> -> vector<16x32xf32>
    %108 = vector.broadcast %7 : vector<1x32xf32> to vector<16x32xf32>
    %109 = arith.addf %107, %108 : vector<16x32xf32>
    %110 = arith.addf %109, %1 : vector<16x32xf32>
    %cst_23 = arith.constant dense<0.000000e+00> : vector<16xf32>
    %111 = vector.multi_reduction <add>, %110, %cst_23 [1] : vector<16x32xf32> to vector<16xf32>
    %112 = vector.shape_cast %111 : vector<16xf32> to vector<16x1xf32>
    %cst_24 = arith.constant 3.200000e+01 : f32
    %113 = vector.broadcast %cst_24 : f32 to vector<16x1xf32>
    %114 = arith.divf %112, %113 : vector<16x1xf32>
    %115 = arith.mulf %110, %110 : vector<16x32xf32>
    %cst_25 = arith.constant dense<0.000000e+00> : vector<16xf32>
    %116 = vector.multi_reduction <add>, %115, %cst_25 [1] : vector<16x32xf32> to vector<16xf32>
    %117 = vector.shape_cast %116 : vector<16xf32> to vector<16x1xf32>
    %cst_26 = arith.constant 3.200000e+01 : f32
    %118 = vector.broadcast %cst_26 : f32 to vector<16x1xf32>
    %119 = arith.divf %117, %118 : vector<16x1xf32>
    %120 = arith.mulf %114, %114 : vector<16x1xf32>
    %121 = arith.subf %119, %120 : vector<16x1xf32>
    %122 = vector.broadcast %114 : vector<16x1xf32> to vector<16x32xf32>
    %123 = arith.subf %110, %122 : vector<16x32xf32>
    %cst_27 = arith.constant 9.99999974E-6 : f32
    %124 = vector.broadcast %cst_27 : f32 to vector<16x1xf32>
    %125 = arith.addf %121, %124 : vector<16x1xf32>
    %126 = math.rsqrt %125 : vector<16x1xf32>
    %127 = vector.broadcast %126 : vector<16x1xf32> to vector<16x32xf32>
    %128 = arith.mulf %123, %127 : vector<16x32xf32>
    %129 = vector.broadcast %10 : vector<1x32xf32> to vector<16x32xf32>
    %130 = arith.mulf %128, %129 : vector<16x32xf32>
    %131 = vector.broadcast %11 : vector<1x32xf32> to vector<16x32xf32>
    %132 = arith.addf %130, %131 : vector<16x32xf32>
    %133 = arith.truncf %132 : vector<16x32xf32> to vector<16x32xbf16>
    %c0_28 = arith.constant 0 : index
    %c0_29 = arith.constant 0 : index
    %134 = vector.load %arg6[%c0_28, %c0_29] : memref<32x128xbf16, #tpu.memory_space<vmem>>, vector<32x128xbf16>
    %cst_30 = arith.constant dense<0.000000e+00> : vector<16x128xf32>
    %135 = tpu.matmul %133, %134, %cst_30 {dimension_numbers = #tpu.dot_dimension_numbers<[1], [0], [0], [1], [0, 0, 1, 1], [], []>} : vector<16x32xbf16>, vector<32x128xbf16>, vector<16x128xf32> -> vector<16x128xf32>
    %136 = vector.broadcast %8 : vector<1x128xf32> to vector<16x128xf32>
    %137 = arith.addf %135, %136 : vector<16x128xf32>
    %cst_31 = arith.constant 0.000000e+00 : f32
    %138 = vector.broadcast %cst_31 : f32 to vector<16x128xf32>
    %139 = arith.maximumf %137, %138 : vector<16x128xf32>
    %140 = arith.truncf %139 : vector<16x128xf32> to vector<16x128xbf16>
    %c0_32 = arith.constant 0 : index
    %c0_33 = arith.constant 0 : index
    %141 = vector.load %arg7[%c0_32, %c0_33] : memref<128x32xbf16, #tpu.memory_space<vmem>>, vector<128x32xbf16>
    %cst_34 = arith.constant dense<0.000000e+00> : vector<16x32xf32>
    %142 = tpu.matmul %140, %141, %cst_34 {dimension_numbers = #tpu.dot_dimension_numbers<[1], [0], [0], [1], [0, 0, 1, 1], [], []>} : vector<16x128xbf16>, vector<128x32xbf16>, vector<16x32xf32> -> vector<16x32xf32>
    %143 = vector.broadcast %9 : vector<1x32xf32> to vector<16x32xf32>
    %144 = arith.addf %142, %143 : vector<16x32xf32>
    %145 = arith.addf %144, %132 : vector<16x32xf32>
    %cst_35 = arith.constant dense<0.000000e+00> : vector<16xf32>
    %146 = vector.multi_reduction <add>, %145, %cst_35 [1] : vector<16x32xf32> to vector<16xf32>
    %147 = vector.shape_cast %146 : vector<16xf32> to vector<16x1xf32>
    %cst_36 = arith.constant 3.200000e+01 : f32
    %148 = vector.broadcast %cst_36 : f32 to vector<16x1xf32>
    %149 = arith.divf %147, %148 : vector<16x1xf32>
    %150 = arith.mulf %145, %145 : vector<16x32xf32>
    %cst_37 = arith.constant dense<0.000000e+00> : vector<16xf32>
    %151 = vector.multi_reduction <add>, %150, %cst_37 [1] : vector<16x32xf32> to vector<16xf32>
    %152 = vector.shape_cast %151 : vector<16xf32> to vector<16x1xf32>
    %cst_38 = arith.constant 3.200000e+01 : f32
    %153 = vector.broadcast %cst_38 : f32 to vector<16x1xf32>
    %154 = arith.divf %152, %153 : vector<16x1xf32>
    %155 = arith.mulf %149, %149 : vector<16x1xf32>
    %156 = arith.subf %154, %155 : vector<16x1xf32>
    %157 = vector.broadcast %149 : vector<16x1xf32> to vector<16x32xf32>
    %158 = arith.subf %145, %157 : vector<16x32xf32>
    %cst_39 = arith.constant 9.99999974E-6 : f32
    %159 = vector.broadcast %cst_39 : f32 to vector<16x1xf32>
    %160 = arith.addf %156, %159 : vector<16x1xf32>
    %161 = math.rsqrt %160 : vector<16x1xf32>
    %162 = vector.broadcast %161 : vector<16x1xf32> to vector<16x32xf32>
    %163 = arith.mulf %158, %162 : vector<16x32xf32>
    %164 = vector.broadcast %12 : vector<1x32xf32> to vector<16x32xf32>
    %165 = arith.mulf %163, %164 : vector<16x32xf32>
    %166 = vector.broadcast %13 : vector<1x32xf32> to vector<16x32xf32>
    %167 = arith.addf %165, %166 : vector<16x32xf32>
    %168 = vector.shape_cast %167 : vector<16x32xf32> to vector<2x8x32xf32>
    %c0_40 = arith.constant 0 : index
    %c0_41 = arith.constant 0 : index
    %c0_42 = arith.constant 0 : index
    %169 = vector.load %arg9[%c0_40, %c0_41, %c0_42] : memref<2x8x32xf32, #tpu.memory_space<vmem>>, vector<2x8x32xf32>
    tpu.vector_store %arg9[%c0_40, %c0_41, %c0_42], %168 {strides = array<i32>} : memref<2x8x32xf32, #tpu.memory_space<vmem>>, vector<2x8x32xf32>,
    return
  }
  func.func @transform_0(%arg0: i32) -> (i32, i32, i32) {
    %c0_i32 = arith.constant 0 : i32
    %c0_i32_0 = arith.constant 0 : i32
    %c0_i32_1 = arith.constant 0 : i32
    return %arg0, %c0_i32, %c0_i32_0 : i32, i32, i32
  }
  func.func @transform_1(%arg0: i32) -> (i32, i32) {
    %c0_i32 = arith.constant 0 : i32
    %c0_i32_0 = arith.constant 0 : i32
    %c0_i32_1 = arith.constant 0 : i32
    return %c0_i32, %c0_i32_0 : i32, i32
  }
  func.func @transform_2(%arg0: i32) -> (i32, i32) {
    %c0_i32 = arith.constant 0 : i32
    %c0_i32_0 = arith.constant 0 : i32
    %c0_i32_1 = arith.constant 0 : i32
    return %c0_i32, %c0_i32_0 : i32, i32
  }
  func.func @transform_3(%arg0: i32) -> (i32, i32) {
    %c0_i32 = arith.constant 0 : i32
    %c0_i32_0 = arith.constant 0 : i32
    %c0_i32_1 = arith.constant 0 : i32
    return %c0_i32, %c0_i32_0 : i32, i32
  }
  func.func @transform_4(%arg0: i32) -> (i32, i32) {
    %c0_i32 = arith.constant 0 : i32
    %c0_i32_0 = arith.constant 0 : i32
    %c0_i32_1 = arith.constant 0 : i32
    return %c0_i32, %c0_i32_0 : i32, i32
  }
  func.func @transform_5(%arg0: i32) -> (i32, i32) {
    %c0_i32 = arith.constant 0 : i32
    %c0_i32_0 = arith.constant 0 : i32
    %c0_i32_1 = arith.constant 0 : i32
    return %c0_i32, %c0_i32_0 : i32, i32
  }
  func.func @transform_6(%arg0: i32) -> (i32, i32) {
    %c0_i32 = arith.constant 0 : i32
    %c0_i32_0 = arith.constant 0 : i32
    %c0_i32_1 = arith.constant 0 : i32
    return %c0_i32, %c0_i32_0 : i32, i32
  }
  func.func @transform_7(%arg0: i32) -> (i32, i32) {
    %c0_i32 = arith.constant 0 : i32
    %c0_i32_0 = arith.constant 0 : i32
    %c0_i32_1 = arith.constant 0 : i32
    return %c0_i32, %c0_i32_0 : i32, i32
  }
  func.func @transform_8(%arg0: i32) -> (i32, i32, i32) {
    %c0_i32 = arith.constant 0 : i32
    %c0_i32_0 = arith.constant 0 : i32
    %c0_i32_1 = arith.constant 0 : i32
    return %arg0, %c0_i32, %c0_i32_0 : i32, i32, i32
  }
}

</mosaic_0001>

<bundles_post_ra>
// kernel: encoder_block.1
= control target key start
LH: loop header
LB: loop body
LE: loop exit
PB: predicated region body
PF: predicated region fallthrough
CT: control target
= control target key end

     0   :  { %vm52_vm0 = vcmask 261120   ;;  %v132_v9 = vlaneseq  ;;  %v1038_v18 = vmov 0.0   ;;  %vm446_vm11 = vcmask 1043456   ;;  %s1274_s2 = inlined_call_operand.vmem [shape: bf16[32,32], index: 2, kind: input, shape index: {}]   ;;  %s1275_s0 = inlined_call_operand.vmem [shape: f32[2,8,32], index: 0, kind: input, shape index: {}]   ;;  %s1276_s1 = inlined_call_operand.vmem [shape: bf16[32,32], index: 1, kind: input, shape index: {}]   ;;  %s1277_s3 = inlined_call_operand.vmem [shape: bf16[32,32], index: 3, kind: input, shape index: {}]   ;;  %s1278_s7 = inlined_call_operand.vmem [shape: f32[16,128], index: 7, kind: input, shape index: {}]   ;;  %s1279_s4 = inlined_call_operand.vmem [shape: bf16[32,32], index: 4, kind: input, shape index: {}]   ;;  %s1280_s5 = inlined_call_operand.vmem [shape: bf16[32,128], index: 5, kind: input, shape index: {}]   ;;  %s1281_s6 = inlined_call_operand.vmem [shape: bf16[128,32], index: 6, kind: input, shape index: {}]   ;;  %s1282_s8 = inlined_call_operand.vmem [shape: f32[2,8,32], index: 8, kind: output, shape index: {}]  }
   0x1   :  { %v979_v0 = vld [vmem:[%s1274_s2 + $0x8] sm:$0xff]  ;;  %v978_v2 = vld [vmem:[%s1274_s2] sm:$0xff]  ;;  %vm322_vm12 = vcmask 64512  }
   0x2   :  { %v977_v1 = vld [vmem:[%s1276_s1 + $0x8] sm:$0xff]  ;;  %93 = vmatpush.bf16.msra.mxu2 %v979_v0  ;;  %v1097_v3 = vld [vmem:[%s1275_s0] sm:$0xff]  ;;  %v133_v10 = vand.u32 127, %v132_v9 }
   0x3   :  { %v1102_v4 = vld [vmem:[%s1275_s0 + $0x8] sm:$0xff]  ;;  %62 = vmatpush.bf16.msra.mxu0 %v977_v1  ;;  %v976_v5 = vld [vmem:[%s1276_s1] sm:$0xff] }
   0x4   :  { %v981_v6 = vld [vmem:[%s1277_s3 + $0x8] sm:$0xff]  ;;  %v32_v7 = vpack.c.bf16 %v1102_v4, %v1097_v3  ;;  %v980_v8 = vld [vmem:[%s1277_s3] sm:$0xff]  ;;  %vm143_vm1 = vcmp.ge.s32.totalorder %v133_v10, 8  ;;  %vm144_vm2 = vcmp.lt.s32.totalorder %v133_v10, 16  ;;  %vm135_vm3 = vcmp.lt.s32.totalorder %v133_v10, 8 }
   0x5   :  { %v1121_v11 = vld [vmem:[%s1278_s7] sm:$0xff]  ;;  %vm145_vm4 = vmand %vm143_vm1, %vm144_vm2  ;;  %v906_v19 = vsel %vm135_vm3, 1.0, %v1038_v18  ;;  %vm152_vm5 = vcmp.ge.s32.totalorder %v133_v10, 16  ;;  %vm153_vm6 = vcmp.lt.s32.totalorder %v133_v10, 24  ;;  %vm161_vm7 = vcmp.ge.s32.totalorder %v133_v10, 24 }
   0x6   :  { %94 = vmatpush.bf16.msra.mxu2 %v978_v2  ;;  %v74_v12 = vperm.slane %v1121_v11, 1  ;;  %v39_v13 = vperm.slane %v1121_v11, 0  ;;  %v907_v20 = vsel %vm145_vm4, 1.0, %v1038_v18  ;;  %vm162_vm8 = vcmp.lt.s32.totalorder %v133_v10, 32  ;;  %vm154_vm9 = vmand %vm152_vm5, %vm153_vm6 }
   0x7   :  { %63 = vmatpush.bf16.msra.mxu0 %v976_v5  ;;  %vm163_vm10 = vmand %vm161_vm7, %vm162_vm8  ;;  %v908_v37 = vsel %vm154_vm9, 1.0, %v1038_v18  ;;  %v105_v48 = vperm.slane %v1121_v11, 2 }
   0x8   :  { %v909_v38 = vsel %vm163_vm10, 1.0, %v1038_v18 }
   0x9   :  { %896 = vmatmul.msk.bf16.vlgmr.msra.gmra.mxu2 %vm52_vm0, %v32_v7 }
   0xa   :  { %124 = vmatpush.bf16.msrb.mxu2 %v981_v6  ;;  %887 = vmatmul.msk.bf16.vlgmr.msra.gmra.mxu0 %vm52_vm0, %v32_v7 }
   0xe   :  { %125 = vmatpush.bf16.msrb.mxu2 %v980_v8 }
  0x19   :  { %905 = vmatmul.msk.bf16.vlgmr.msrb.gmra.mxu2 %vm52_vm0, %v32_v7 }
  0x87   :  { %v65_v14 = vpop.f32.mrf.mxu0 }
  0x88   :  { %v66_v17 = vadd.f32 %v65_v14, %v39_v13 }
  0x8a   :  { %v139_v23 = vmul.f32 %v906_v19, %v66_v17  ;;  %v148_v24 = vmul.f32 %v907_v20, %v66_v17  ;;  %v157_v39 = vmul.f32 %v908_v37, %v66_v17  ;;  %v166_v40 = vmul.f32 %v909_v38, %v66_v17 }
  0x8c   :  { %v96_v15 = vpop.f32.mrf.mxu2  ;;  %v170_v28 = vpack.c.bf16 %v139_v23, %v139_v23  ;;  %v172_v29 = vpack.c.bf16 %v148_v24, %v148_v24  ;;  %v174_v41 = vpack.c.bf16 %v157_v39, %v157_v39  ;;  %v176_v42 = vpack.c.bf16 %v166_v40, %v166_v40 }
  0x8d   :  { %v97_v16 = vadd.f32 %v96_v15, %v74_v12 }
  0x8f   :  { %v186_v21 = vpack.c.bf16 %v97_v16, %v97_v16  ;;  %v67_v26 = vpop.f32.mrf.mxu0 }
  0x90   :  { %v68_v31 = vadd.f32 %v67_v26, %v39_v13 }
  0x91   :  { %v192_v22 = vsel %vm52_vm0, %v186_v21, 0 }
  0x92   :  { %201 = vmatpush.bf16.xpose.msra.mxu3 %v192_v22  ;;  %236 = vmatpush.bf16.xpose.msra.mxu1 %v192_v22  ;;  %v149_v33 = vmul.f32 %v907_v20, %v68_v31  ;;  %v140_v34 = vmul.f32 %v906_v19, %v68_v31  ;;  %v158_v43 = vmul.f32 %v908_v37, %v68_v31 }
  0x93   :  { %v167_v44 = vmul.f32 %v909_v38, %v68_v31 }
  0x94   :  { %v98_v25 = vpop.f32.mrf.mxu2  ;;  %v173_v35 = vpack.c.bf16 %v149_v33, %v149_v33  ;;  %v171_v36 = vpack.c.bf16 %v140_v34, %v140_v34  ;;  %v175_v45 = vpack.c.bf16 %v158_v43, %v158_v43 }
  0x95   :  { %v99_v27 = vadd.f32 %v98_v25, %v74_v12  ;;  %v177_v46 = vpack.c.bf16 %v167_v44, %v167_v44 }
  0x97   :  { %v187_v30 = vpack.c.bf16 %v99_v27, %v99_v27 }
  0x99   :  { %v211_v32 = vsel %vm52_vm0, %v187_v30, 0  ;;  %910 = vmatmul.msk.bf16.vlgmr.msra.gmra.mxu3 %vm52_vm0, %v170_v28  ;;  %912 = vmatmul.msk.bf16.vlgmr.msra.gmra.mxu1 %vm52_vm0, %v172_v29 }
  0x9a   :  { %268 = vmatpush.bf16.xpose.msrb.mxu3 %v192_v22  ;;  %300 = vmatpush.bf16.xpose.msrb.mxu1 %v192_v22 }
  0x9b   :  { %220 = vmatpush.bf16.xpose.msrb.mxu0 %v211_v32  ;;  %252 = vmatpush.bf16.xpose.msra.mxu2 %v211_v32 }
  0x9c   :  { %v127_v47 = vpop.f32.mrf.mxu2 }
  0x9d   :  { %v128_v49 = vadd.f32 %v127_v47, %v105_v48 }
  0x9f   :  { %v141_v52 = vmul.f32 %v906_v19, %v128_v49  ;;  %v150_v54 = vmul.f32 %v907_v20, %v128_v49  ;;  %v159_v56 = vmul.f32 %v908_v37, %v128_v49  ;;  %v168_v58 = vmul.f32 %v909_v38, %v128_v49 }
  0xa1   :  { %v178_v59 = vpack.c.bf16 %v141_v52, %v141_v52  ;;  %v180_v61 = vpack.c.bf16 %v150_v54, %v150_v54  ;;  %v182_v0 = vpack.c.bf16 %v159_v56, %v159_v56  ;;  %v184_v7 = vpack.c.bf16 %v168_v58, %v168_v58 }
  0xa2   :  { %911 = vmatmul.msk.bf16.vlgmr.msrb.gmra.mxu0 %vm52_vm0, %v171_v36  ;;  %913 = vmatmul.msk.bf16.vlgmr.msra.gmra.mxu2 %vm52_vm0, %v173_v35 }
  0xa3   :  { %284 = vmatpush.bf16.xpose.msra.mxu0 %v211_v32  ;;  %316 = vmatpush.bf16.xpose.msrb.mxu2 %v211_v32  ;;  %v448_v2 = vsel %vm446_vm11, %v178_v59, 0  ;;  %v486_v6 = vsel %vm446_vm11, %v180_v61, 0  ;;  %v524_v9 = vsel %vm446_vm11, %v182_v0, 0  ;;  %v562_v13 = vsel %vm446_vm11, %v184_v7, 0 }
  0xa4   :  { %v129_v50 = vpop.f32.mrf.mxu2  ;;  %457 = vmatpush.bf16.msra.mxu3 %v448_v2  ;;  %495 = vmatpush.bf16.msra.mxu1 %v486_v6 }
  0xa5   :  { %v130_v51 = vadd.f32 %v129_v50, %v105_v48 }
  0xa7   :  { %v142_v53 = vmul.f32 %v906_v19, %v130_v51  ;;  %v151_v55 = vmul.f32 %v907_v20, %v130_v51  ;;  %v160_v57 = vmul.f32 %v908_v37, %v130_v51  ;;  %v169_v62 = vmul.f32 %v909_v38, %v130_v51 }
  0xa9   :  { %914 = vmatmul.msk.bf16.vlgmr.msrb.gmra.mxu3 %vm52_vm0, %v174_v41  ;;  %916 = vmatmul.msk.bf16.vlgmr.msrb.gmra.mxu1 %vm52_vm0, %v176_v42  ;;  %v179_v60 = vpack.c.bf16 %v142_v53, %v142_v53  ;;  %v181_v63 = vpack.c.bf16 %v151_v55, %v151_v55  ;;  %v183_v1 = vpack.c.bf16 %v160_v57, %v160_v57 }
  0xaa   :  { %v185_v12 = vpack.c.bf16 %v169_v62, %v169_v62  ;;  %533 = vmatpush.bf16.msrb.mxu3 %v524_v9  ;;  %571 = vmatpush.bf16.msrb.mxu1 %v562_v13 }
  0xab   :  { %v467_v5 = vsel %vm446_vm11, %v179_v60, 0  ;;  %v505_v8 = vsel %vm446_vm11, %v181_v63, 0  ;;  %v543_v10 = vsel %vm446_vm11, %v183_v1, 0 }
  0xac   :  { %476 = vmatpush.bf16.msrb.mxu0 %v467_v5  ;;  %514 = vmatpush.bf16.msra.mxu2 %v505_v8  ;;  %v581_v14 = vsel %vm446_vm11, %v185_v12, 0 }
  0xb2   :  { %915 = vmatmul.msk.bf16.vlgmr.msra.gmra.mxu0 %vm52_vm0, %v175_v45  ;;  %917 = vmatmul.msk.bf16.vlgmr.msrb.gmra.mxu2 %vm52_vm0, %v177_v46 }
  0xb3   :  { %552 = vmatpush.bf16.msra.mxu0 %v543_v10  ;;  %590 = vmatpush.bf16.msrb.mxu2 %v581_v14 }
 0x116   :  { %v238_v15 = vpop.f32.mrf.mxu1 }
 0x117   :  { %v329_v26 = vsel %vm322_vm12, %v238_v15, -inf }
 0x11c   :  { %v203_v16 = vpop.f32.mrf.mxu3 }
 0x11d   :  { %v323_v17 = vsel %vm322_vm12, %v203_v16, -inf }
 0x11e   :  { %v240_v19 = vpop.f32.mrf.mxu1  ;;  %324 = vmax.xlane.f32.xlu0 %v323_v17 }
 0x11f   :  { %v222_v18 = vpop.f32.mrf.mxu0 }
 0x120   :  { %v326_v20 = vsel %vm322_vm12, %v222_v18, -inf }
 0x121   :  { %327 = vmax.xlane.f32.xlu1 %v326_v20 }
 0x124   :  { %v205_v21 = vpop.f32.mrf.mxu3 }
 0x125   :  { %v254_v22 = vpop.f32.mrf.mxu2 }
 0x126   :  { %v332_v23 = vsel %vm322_vm12, %v254_v22, -inf  ;;  %v302_v25 = vpop.f32.mrf.mxu1 }
 0x127   :  { %v224_v24 = vpop.f32.mrf.mxu0  ;;  %333 = vmax.xlane.f32.xlu0 %v332_v23  ;;  %v341_v32 = vsel %vm322_vm12, %v302_v25, -inf }
 0x129   :  { %330 = vmax.xlane.f32.xlu1 %v329_v26 }
 0x12c   :  { %v270_v28 = vpop.f32.mrf.mxu3 }
 0x12d   :  { %v256_v27 = vpop.f32.mrf.mxu2  ;;  %v335_v29 = vsel %vm322_vm12, %v270_v28, -inf }
 0x12e   :  { %v304_v31 = vpop.f32.mrf.mxu1  ;;  %336 = vmax.xlane.f32.xlu2 %v335_v29 }
 0x12f   :  { %v286_v30 = vpop.f32.mrf.mxu0 }
 0x130   :  { %v338_v33 = vsel %vm322_vm12, %v286_v30, -inf }
 0x131   :  { %342 = vmax.xlane.f32.xlu1 %v341_v32  ;;  %339 = vmax.xlane.f32.xlu0 %v338_v33 }
 0x134   :  { %v272_v34 = vpop.f32.mrf.mxu3 }
 0x135   :  { %v318_v35 = vpop.f32.mrf.mxu2 }
 0x136   :  { %v344_v36 = vsel %vm322_vm12, %v318_v35, -inf }
 0x137   :  { %v288_v37 = vpop.f32.mrf.mxu0  ;;  %345 = vmax.xlane.f32.xlu2 %v344_v36 }
 0x13d   :  { %v320_v38 = vpop.f32.mrf.mxu2 }
 0x191   :  { %v325_v39 = vpop.xlane.xlu0 %324 }
 0x192   :  { %v347_v40 = vsub.f32 %v203_v16, %v325_v39 }
 0x194   :  { %v328_v41 = vpop.xlane.xlu1 %327  ;;  %v355_v42 = vmul.f32 1.442695, %v347_v40 }
 0x195   :  { %v348_v43 = vsub.f32 %v222_v18, %v328_v41 }
 0x196   :  { %996 = vpow2.f32 %v355_v42 }
 0x197   :  { %v357_v44 = vmul.f32 1.442695, %v348_v43 }
 0x199   :  { %998 = vpow2.f32 %v357_v44 }
 0x19a   :  { %v334_v45 = vpop.xlane.xlu0 %333 }
 0x19b   :  { %v350_v46 = vsub.f32 %v254_v22, %v334_v45 }
 0x19c   :  { %v331_v47 = vpop.xlane.xlu1 %330  ;;  %v997_v48 = vpop.eup %996 }
 0x19d   :  { %v361_v49 = vmul.f32 1.442695, %v350_v46  ;;  %v349_v50 = vsub.f32 %v238_v15, %v331_v47  ;;  %v371_v51 = vsel %vm322_vm12, %v997_v48, 0.0 }
 0x19e   :  { %372 = vadd.xlane.f32.xlu2 %v371_v51 }
 0x19f   :  { %v999_v52 = vpop.eup %998  ;;  %1000 = vpow2.f32 %v361_v49  ;;  %v359_v53 = vmul.f32 1.442695, %v349_v50 }
 0x1a0   :  { %v374_v54 = vsel %vm322_vm12, %v999_v52, 0.0 }
 0x1a1   :  { %1002 = vpow2.f32 %v359_v53  ;;  %375 = vadd.xlane.f32.xlu1 %v374_v54  ;;  %v337_v55 = vpop.xlane.xlu2 %336 }
 0x1a2   :  { %v351_v56 = vsub.f32 %v270_v28, %v337_v55 }
 0x1a4   :  { %v343_v57 = vpop.xlane.xlu1 %342  ;;  %v340_v58 = vpop.xlane.xlu0 %339  ;;  %v363_v60 = vmul.f32 1.442695, %v351_v56 }
 0x1a5   :  { %v1154_v59 = vpop.eup %1000  ;;  %v353_v61 = vsub.f32 %v302_v25, %v343_v57  ;;  %v352_v62 = vsub.f32 %v286_v30, %v340_v58 }
 0x1a6   :  { %v380_v63 = vsel %vm322_vm12, %v1154_v59, 0.0  ;;  %1004 = vpow2.f32 %v363_v60 }
 0x1a7   :  { %v1003_v0 = vpop.eup %1002  ;;  %v365_v1 = vmul.f32 1.442695, %v352_v62  ;;  %381 = vadd.xlane.f32.xlu0 %v380_v63  ;;  %v367_v5 = vmul.f32 1.442695, %v353_v61 }
 0x1a8   :  { %v377_v2 = vsel %vm322_vm12, %v1003_v0, 0.0 }
 0x1a9   :  { %378 = vadd.xlane.f32.xlu2 %v377_v2  ;;  %1006 = vpow2.f32 %v365_v1 }
 0x1aa   :  { %v346_v6 = vpop.xlane.xlu2 %345  ;;  %1008 = vpow2.f32 %v367_v5 }
 0x1ab   :  { %v354_v7 = vsub.f32 %v318_v35, %v346_v6 }
 0x1ac   :  { %v1159_v8 = vpop.eup %1004 }
 0x1ad   :  { %v369_v9 = vmul.f32 1.442695, %v354_v7  ;;  %v383_v10 = vsel %vm322_vm12, %v1159_v8, 0.0 }
 0x1af   :  { %1010 = vpow2.f32 %v369_v9  ;;  %384 = vadd.xlane.f32.xlu0 %v383_v10  ;;  %v1163_v12 = vpop.eup %1006 }
 0x1b0   :  { %v386_v13 = vsel %vm322_vm12, %v1163_v12, 0.0  ;;  %v1167_v14 = vpop.eup %1008 }
 0x1b1   :  { %387 = vadd.xlane.f32.xlu2 %v386_v13  ;;  %v389_v16 = vsel %vm322_vm12, %v1167_v14, 0.0 }
 0x1b5   :  { %v1169_v15 = vpop.eup %1010 }
 0x1b6   :  { %v392_v17 = vsel %vm322_vm12, %v1169_v15, 0.0 }
 0x1b7   :  { %390 = vadd.xlane.f32.xlu0 %v389_v16  ;;  %393 = vadd.xlane.f32.xlu1 %v392_v17  ;;  %v982_v16 = vld [vmem:[%s1279_s4] sm:$0xff] }
 0x211   :  { %v373_v18 = vpop.xlane.xlu2 %372 }
 0x212   :  { %1012 = vrcp.f32 %v373_v18 }
 0x214   :  { %v376_v19 = vpop.xlane.xlu1 %375 }
 0x215   :  { %1014 = vrcp.f32 %v376_v19 }
 0x218   :  { %v1013_v20 = vpop.eup %1012 }
 0x219   :  { %v403_v21 = vmul.f32 %v1013_v20, %v373_v18 }
 0x21a   :  { %v382_v22 = vpop.xlane.xlu0 %381 }
 0x21b   :  { %v1015_v23 = vpop.eup %1014  ;;  %1016 = vrcp.f32 %v382_v22  ;;  %v411_v24 = vsub.f32 2.0, %v403_v21 }
 0x21c   :  { %v404_v25 = vmul.f32 %v1015_v23, %v376_v19  ;;  %v379_v26 = vpop.xlane.xlu2 %378 }
 0x21d   :  { %1018 = vrcp.f32 %v379_v26  ;;  %v419_v27 = vmul.f32 %v1013_v20, %v411_v24 }
 0x21e   :  { %v412_v28 = vsub.f32 2.0, %v404_v25 }
 0x21f   :  { %v427_v29 = vmul.f32 %v997_v48, %v419_v27 }
 0x220   :  { %v420_v30 = vmul.f32 %v1015_v23, %v412_v28 }
 0x221   :  { %v1017_v31 = vpop.eup %1016  ;;  %v435_v32 = vpack.c.bf16 %v427_v29, %v427_v29 }
 0x222   :  { %v428_v33 = vmul.f32 %v999_v52, %v420_v30  ;;  %v406_v34 = vmul.f32 %v1017_v31, %v382_v22  ;;  %v385_v35 = vpop.xlane.xlu0 %384 }
 0x223   :  { %v1019_v36 = vpop.eup %1018  ;;  %1020 = vrcp.f32 %v385_v35  ;;  %918 = vmatmul.msk.bf16.vlgmr.msra.gmra.mxu3 %vm322_vm12, %v435_v32 }
 0x224   :  { %v436_v37 = vpack.c.bf16 %v428_v33, %v428_v33  ;;  %v414_v38 = vsub.f32 2.0, %v406_v34  ;;  %v405_v39 = vmul.f32 %v1019_v36, %v379_v26  ;;  %v388_v40 = vpop.xlane.xlu2 %387 }
 0x225   :  { %1022 = vrcp.f32 %v388_v40 }
 0x226   :  { %v422_v41 = vmul.f32 %v1017_v31, %v414_v38  ;;  %v413_v42 = vsub.f32 2.0, %v405_v39  ;;  %919 = vmatmul.msk.bf16.vlgmr.msrb.gmra.mxu0 %vm322_vm12, %v436_v37  ;;  %v607_v38 = vperm.slane %v1121_v11, 3 }
 0x228   :  { %v430_v43 = vmul.f32 %v1154_v59, %v422_v41  ;;  %v421_v44 = vmul.f32 %v1019_v36, %v413_v42 }
 0x229   :  { %v1021_v45 = vpop.eup %1020 }
 0x22a   :  { %v438_v46 = vpack.c.bf16 %v430_v43, %v430_v43  ;;  %v429_v47 = vmul.f32 %v1003_v0, %v421_v44  ;;  %v407_v48 = vmul.f32 %v1021_v45, %v385_v35  ;;  %v391_v49 = vpop.xlane.xlu0 %390  ;;  %v394_v50 = vpop.xlane.xlu1 %393 }
 0x22b   :  { %1024 = vrcp.f32 %v391_v49  ;;  %v1023_v51 = vpop.eup %1022 }
 0x22c   :  { %v437_v52 = vpack.c.bf16 %v429_v47, %v429_v47  ;;  %v415_v53 = vsub.f32 2.0, %v407_v48  ;;  %1026 = vrcp.f32 %v394_v50  ;;  %921 = vmatmul.msk.bf16.vlgmr.msra.gmra.mxu2 %vm322_vm12, %v438_v46  ;;  %v408_v54 = vmul.f32 %v1023_v51, %v388_v40 }
 0x22e   :  { %v423_v55 = vmul.f32 %v1021_v45, %v415_v53  ;;  %920 = vmatmul.msk.bf16.vlgmr.msra.gmra.mxu1 %vm322_vm12, %v437_v52  ;;  %v416_v56 = vsub.f32 2.0, %v408_v54 }
 0x230   :  { %v431_v57 = vmul.f32 %v1159_v8, %v423_v55  ;;  %v424_v59 = vmul.f32 %v1023_v51, %v416_v56 }
 0x231   :  { %v1025_v58 = vpop.eup %1024 }
 0x232   :  { %v1027_v60 = vpop.eup %1026  ;;  %v439_v61 = vpack.c.bf16 %v431_v57, %v431_v57  ;;  %v409_v62 = vmul.f32 %v1025_v58, %v391_v49  ;;  %v432_v63 = vmul.f32 %v1163_v12, %v424_v59  ;;  %v983_v12 = vld [vmem:[%s1279_s4 + $0x8] sm:$0xff] }
 0x233   :  { %v410_v0 = vmul.f32 %v1027_v60, %v394_v50  ;;  %629 = vmatpush.bf16.msra.mxu3 %v983_v12  ;;  %v1039_v50 = vmov 32.0   ;;  %v985_v59 = vld [vmem:[%s1280_s5 + $0x8] sm:$0xff] }
 0x234   :  { %v417_v1 = vsub.f32 2.0, %v409_v62  ;;  %922 = vmatmul.msk.bf16.vlgmr.msrb.gmra.mxu3 %vm322_vm12, %v439_v61  ;;  %v440_v2 = vpack.c.bf16 %v432_v63, %v432_v63  ;;  %1028 = vrcp.f32 %v1039_v50  ;;  %727 = vmatpush.bf16.msrb.mxu0 %v985_v59  ;;  %v984_v63 = vld [vmem:[%s1280_s5] sm:$0xff] }
 0x235   :  { %v418_v5 = vsub.f32 2.0, %v410_v0 }
 0x236   :  { %v425_v6 = vmul.f32 %v1025_v58, %v417_v1  ;;  %923 = vmatmul.msk.bf16.vlgmr.msra.gmra.mxu0 %vm322_vm12, %v440_v2 }
 0x237   :  { %v426_v7 = vmul.f32 %v1027_v60, %v418_v5  ;;  %630 = vmatpush.bf16.msra.mxu3 %v982_v16 }
 0x238   :  { %v433_v9 = vmul.f32 %v1167_v14, %v425_v6  ;;  %728 = vmatpush.bf16.msrb.mxu0 %v984_v63 }
 0x239   :  { %v434_v8 = vmul.f32 %v1169_v15, %v426_v7 }
 0x23a   :  { %v441_v13 = vpack.c.bf16 %v433_v9, %v433_v9  ;;  %v1029_v51 = vpop.eup %1028  ;;  %v993_v9 = vld [vmem:[%s1281_s6 + $0x38] sm:$0xff] }
 0x23b   :  { %v442_v10 = vpack.c.bf16 %v434_v8, %v434_v8  ;;  %v646_v52 = vmul.f32 32.0, %v1029_v51  ;;  %vm650_vm13 = vweird.f32 %v1029_v51  ;;  %803 = vmatpush.bf16.msra.mxu1 %v993_v9 }
 0x23d   :  { %925 = vmatmul.msk.bf16.vlgmr.msrb.gmra.mxu2 %vm322_vm12, %v442_v10  ;;  %v647_v53 = vsub.f32 1.0, %v646_v52  ;;  %v992_v10 = vld [vmem:[%s1281_s6 + $0x30] sm:$0xff] }
 0x23e   :  { %924 = vmatmul.msk.bf16.vlgmr.msrb.gmra.mxu1 %vm322_vm12, %v441_v13 }
 0x23f   :  { %v648_v54 = vmul.f32 %v1029_v51, %v647_v53  ;;  %804 = vmatpush.bf16.msra.mxu1 %v992_v10 }
 0x241   :  { %v649_v55 = vadd.f32 %v1029_v51, %v648_v54 }
 0x2a3   :  { %v478_v17 = vpop.f32.mrf.mxu0 }
 0x2a6   :  { %v459_v14 = vpop.f32.mrf.mxu3 }
 0x2ab   :  { %v480_v18 = vpop.f32.mrf.mxu0  ;;  %v497_v15 = vpop.f32.mrf.mxu1 }
 0x2ac   :  { %v596_v27 = vadd.f32 %v497_v15, %v459_v14  ;;  %v990_v15 = vld [vmem:[%s1281_s6 + $0x20] sm:$0xff] }
 0x2ae   :  { %v461_v19 = vpop.f32.mrf.mxu3 }
 0x2af   :  { %v516_v20 = vpop.f32.mrf.mxu2 }
 0x2b0   :  { %v597_v28 = vadd.f32 %v516_v20, %v478_v17  ;;  %v991_v17 = vld [vmem:[%s1281_s6 + $0x28] sm:$0xff] }
 0x2b1   :  { %805 = vmatpush.bf16.msra.mxu1 %v991_v17 }
 0x2b3   :  { %v499_v21 = vpop.f32.mrf.mxu1  ;;  %v554_v22 = vpop.f32.mrf.mxu0 }
 0x2b4   :  { %v599_v29 = vadd.f32 %v597_v28, %v554_v22  ;;  %v694_v28 = vperm.slane %v1121_v11, 6 }
 0x2b5   :  { %806 = vmatpush.bf16.msra.mxu1 %v990_v15 }
 0x2b7   :  { %v518_v23 = vpop.f32.mrf.mxu2  ;;  %v535_v24 = vpop.f32.mrf.mxu3 }
 0x2b8   :  { %v598_v30 = vadd.f32 %v596_v27, %v535_v24 }
 0x2bb   :  { %v573_v25 = vpop.f32.mrf.mxu1  ;;  %v556_v26 = vpop.f32.mrf.mxu0 }
 0x2bc   :  { %v600_v33 = vadd.f32 %v598_v30, %v573_v25 }
 0x2bf   :  { %v537_v31 = vpop.f32.mrf.mxu3 }
 0x2c0   :  { %v592_v32 = vpop.f32.mrf.mxu2 }
 0x2c1   :  { %v601_v34 = vadd.f32 %v599_v29, %v592_v32 }
 0x2c3   :  { %v602_v35 = vpack.c.bf16 %v601_v34, %v600_v33  ;;  %v575_v36 = vpop.f32.mrf.mxu1 }
 0x2c5   :  { %934 = vmatmul.msk.bf16.vlgmr.msra.gmra.mxu3 %vm52_vm0, %v602_v35  ;;  %v697_v35 = vperm.slane %v1121_v11, 7 }
 0x2c8   :  { %v594_v37 = vpop.f32.mrf.mxu2 }
 0x348   :  { %v632_v39 = vpop.f32.mrf.mxu3 }
 0x349   :  { %v633_v40 = vadd.f32 %v632_v39, %v607_v38 }
 0x34b   :  { %v1197_v41 = vadd.f32 %v633_v40, %v1097_v3  ;;  %v989_v40 = vld [vmem:[%s1281_s6 + $0x18] sm:$0xff] }
 0x34c   :  { %807 = vmatpush.bf16.msra.mxu1 %v989_v40 }
 0x34d   :  { %v639_v42 = vsel %vm52_vm0, %v1197_v41, 0.0  ;;  %v654_v43 = vmul.f32 %v1197_v41, %v1197_v41 }
 0x34e   :  { %640 = vadd.xlane.f32.xlu1 %v639_v42  ;;  %v987_v42 = vld [vmem:[%s1281_s6 + $0x8] sm:$0xff] }
 0x34f   :  { %v656_v44 = vsel %vm52_vm0, %v654_v43, 0.0  ;;  %v986_v43 = vld [vmem:[%s1281_s6] sm:$0xff] }
 0x350   :  { %v634_v45 = vpop.f32.mrf.mxu3  ;;  %657 = vadd.xlane.f32.xlu0 %v656_v44 }
 0x351   :  { %v635_v46 = vadd.f32 %v634_v45, %v607_v38  ;;  %v705_v45 = vperm.slane %v1121_v11, 4 }
 0x353   :  { %v1205_v47 = vadd.f32 %v635_v46, %v1102_v4  ;;  %v1212_v4 = vsel %vm650_vm13, %v1029_v51, %v649_v55  ;;  %v754_v51 = vperm.slane %v1121_v11, 5 }
 0x355   :  { %v642_v48 = vsel %vm52_vm0, %v1205_v47, 0.0  ;;  %v655_v3 = vmul.f32 %v1205_v47, %v1205_v47 }
 0x356   :  { %643 = vadd.xlane.f32.xlu2 %v642_v48 }
 0x357   :  { %v659_v49 = vsel %vm52_vm0, %v655_v3, 0.0 }
 0x358   :  { %660 = vadd.xlane.f32.xlu1 %v659_v49 }
 0x3c1   :  { %v641_v56 = vpop.xlane.xlu1 %640 }
 0x3c2   :  { %v652_v57 = vmul.f32 %v1212_v4, %v641_v56 }
 0x3c3   :  { %v658_v58 = vpop.xlane.xlu0 %657 }
 0x3c4   :  { %v664_v60 = vmul.f32 %v652_v57, %v652_v57  ;;  %v662_v61 = vmul.f32 %v658_v58, %v1212_v4  ;;  %v668_v26 = vsub.f32 %v1197_v41, %v652_v57  ;;  %v988_v41 = vld [vmem:[%s1281_s6 + $0x10] sm:$0xff] }
 0x3c5   :  { %808 = vmatpush.bf16.msra.mxu1 %v988_v41 }
 0x3c6   :  { %v666_v62 = vsub.f32 %v662_v61, %v664_v60 }
 0x3c8   :  { %v670_v0 = vadd.f32 1e-05, %v666_v62 }
 0x3c9   :  { %v644_v1 = vpop.xlane.xlu2 %643  ;;  %809 = vmatpush.bf16.msra.mxu1 %v987_v42 }
 0x3ca   :  { %1030 = vrsqrt.f32 %v670_v0  ;;  %v653_v2 = vmul.f32 %v1212_v4, %v644_v1  ;;  %vm678_vm15 = vweird.f32 %v670_v0 }
 0x3cb   :  { %v661_v5 = vpop.xlane.xlu1 %660 }
 0x3cc   :  { %v665_v6 = vmul.f32 %v653_v2, %v653_v2  ;;  %v663_v7 = vmul.f32 %v661_v5, %v1212_v4  ;;  %v669_v31 = vsub.f32 %v1205_v47, %v653_v2 }
 0x3cd   :  { %810 = vmatpush.bf16.msra.mxu1 %v986_v43 }
 0x3ce   :  { %v667_v8 = vsub.f32 %v663_v7, %v665_v6 }
 0x3d0   :  { %v1031_v13 = vpop.eup %1030  ;;  %v671_v12 = vadd.f32 1e-05, %v667_v8 }
 0x3d1   :  { %v673_v16 = vmul.f32 %v1031_v13, %v670_v0  ;;  %vm679_vm14 = vweird.f32 %v1031_v13 }
 0x3d2   :  { %1032 = vrsqrt.f32 %v671_v12  ;;  %vm680_vm1 = vmor %vm678_vm15, %vm679_vm14  ;;  %vm688_vm3 = vweird.f32 %v671_v12 }
 0x3d3   :  { %v674_v14 = vmul.f32 %v1031_v13, %v673_v16 }
 0x3d5   :  { %v675_v18 = vmul.f32 0.5, %v674_v14 }
 0x3d7   :  { %v676_v19 = vsub.f32 1.5, %v675_v18 }
 0x3d8   :  { %v1033_v20 = vpop.eup %1032 }
 0x3d9   :  { %v677_v21 = vmul.f32 %v1031_v13, %v676_v19  ;;  %v683_v22 = vmul.f32 %v1033_v20, %v671_v12  ;;  %vm689_vm2 = vweird.f32 %v1033_v20 }
 0x3da   :  { %vm690_vm4 = vmor %vm688_vm3, %vm689_vm2 }
 0x3db   :  { %v684_v23 = vmul.f32 %v1033_v20, %v683_v22  ;;  %v681_v24 = vsel %vm680_vm1, %v1031_v13, %v677_v21 }
 0x3dc   :  { %v692_v29 = vmul.f32 %v681_v24, %v668_v26 }
 0x3dd   :  { %v685_v25 = vmul.f32 0.5, %v684_v23 }
 0x3de   :  { %v695_v33 = vmul.f32 %v694_v28, %v692_v29 }
 0x3df   :  { %v686_v27 = vsub.f32 1.5, %v685_v25 }
 0x3e0   :  { %v698_v37 = vadd.f32 %v697_v35, %v695_v33 }
 0x3e1   :  { %v687_v30 = vmul.f32 %v1033_v20, %v686_v27 }
 0x3e3   :  { %v691_v32 = vsel %vm690_vm4, %v1033_v20, %v687_v30  ;;  %v34_v20 = vld [vmem:[%s1278_s7 + $0x8] sm:$0xff] }
 0x3e4   :  { %v693_v34 = vmul.f32 %v691_v32, %v669_v31  ;;  %v867_v26 = vperm.slane %v34_v20, 0 }
 0x3e6   :  { %v696_v36 = vmul.f32 %v694_v28, %v693_v34  ;;  %v870_v28 = vperm.slane %v34_v20, 1 }
 0x3e8   :  { %v699_v38 = vadd.f32 %v697_v35, %v696_v36 }
 0x3ea   :  { %v700_v39 = vpack.c.bf16 %v699_v38, %v698_v37 }
 0x3ec   :  { %943 = vmatmul.msk.bf16.vlgmr.msrb.gmra.mxu0 %vm52_vm0, %v700_v39 }
 0x469   :  { %v730_v44 = vpop.f32.mrf.mxu0 }
 0x46a   :  { %v731_v46 = vadd.f32 %v730_v44, %v705_v45 }
 0x46c   :  { %v735_v3 = vmax.f32 %v731_v46, 0.0 }
 0x471   :  { %v732_v47 = vpop.f32.mrf.mxu0 }
 0x472   :  { %v733_v48 = vadd.f32 %v732_v47, %v705_v45 }
 0x474   :  { %v736_v49 = vmax.f32 %v733_v48, 0.0 }
 0x476   :  { %v737_v50 = vpack.c.bf16 %v736_v49, %v735_v3 }
 0x478   :  { %811 = vmatmul.bf16.vlgmr.msra.gmra.mxu1 %v737_v50 }
 0x4f5   :  { %v812_v52 = vpop.f32.mrf.mxu1 }
 0x4f6   :  { %v813_v53 = vadd.f32 %v812_v52, %v754_v51 }
 0x4f8   :  { %v817_v54 = vadd.f32 %v813_v53, %v698_v37 }
 0x4fa   :  { %v819_v55 = vsel %vm52_vm0, %v817_v54, 0.0  ;;  %v827_v56 = vmul.f32 %v817_v54, %v817_v54 }
 0x4fb   :  { %820 = vadd.xlane.f32.xlu2 %v819_v55 }
 0x4fc   :  { %v829_v57 = vsel %vm52_vm0, %v827_v56, 0.0 }
 0x4fd   :  { %v814_v58 = vpop.f32.mrf.mxu1  ;;  %830 = vadd.xlane.f32.xlu1 %v829_v57 }
 0x4fe   :  { %v815_v59 = vadd.f32 %v814_v58, %v754_v51 }
 0x500   :  { %v818_v60 = vadd.f32 %v815_v59, %v699_v38 }
 0x502   :  { %v822_v61 = vsel %vm52_vm0, %v818_v60, 0.0  ;;  %v828_v62 = vmul.f32 %v818_v60, %v818_v60 }
 0x503   :  { %823 = vadd.xlane.f32.xlu0 %v822_v61 }
 0x504   :  { %v832_v63 = vsel %vm52_vm0, %v828_v62, 0.0 }
 0x505   :  { %833 = vadd.xlane.f32.xlu2 %v832_v63 }
 0x56e   :  { %v821_v11 = vpop.xlane.xlu2 %820 }
 0x56f   :  { %v825_v0 = vmul.f32 %v821_v11, %v1212_v4 }
 0x570   :  { %v831_v1 = vpop.xlane.xlu1 %830 }
 0x571   :  { %v837_v2 = vmul.f32 %v825_v0, %v825_v0  ;;  %v835_v5 = vmul.f32 %v831_v1, %v1212_v4  ;;  %v841_v25 = vsub.f32 %v817_v54, %v825_v0 }
 0x573   :  { %v839_v6 = vsub.f32 %v835_v5, %v837_v2 }
 0x575   :  { %v843_v7 = vadd.f32 1e-05, %v839_v6 }
 0x576   :  { %v824_v9 = vpop.xlane.xlu0 %823 }
 0x577   :  { %1034 = vrsqrt.f32 %v843_v7  ;;  %v826_v8 = vmul.f32 %v824_v9, %v1212_v4  ;;  %vm851_vm6 = vweird.f32 %v843_v7 }
 0x578   :  { %v834_v10 = vpop.xlane.xlu2 %833 }
 0x579   :  { %v838_v13 = vmul.f32 %v826_v8, %v826_v8  ;;  %v836_v12 = vmul.f32 %v834_v10, %v1212_v4  ;;  %v842_v35 = vsub.f32 %v818_v60, %v826_v8 }
 0x57b   :  { %v840_v16 = vsub.f32 %v836_v12, %v838_v13 }
 0x57d   :  { %v1035_v17 = vpop.eup %1034  ;;  %v844_v14 = vadd.f32 1e-05, %v840_v16 }
 0x57e   :  { %v846_v18 = vmul.f32 %v1035_v17, %v843_v7  ;;  %vm852_vm5 = vweird.f32 %v1035_v17 }
 0x57f   :  { %1036 = vrsqrt.f32 %v844_v14  ;;  %vm853_vm7 = vmor %vm851_vm6, %vm852_vm5  ;;  %vm861_vm9 = vweird.f32 %v844_v14 }
 0x580   :  { %v847_v15 = vmul.f32 %v1035_v17, %v846_v18 }
 0x582   :  { %v848_v19 = vmul.f32 0.5, %v847_v15 }
 0x584   :  { %v849_v21 = vsub.f32 1.5, %v848_v19 }
 0x585   :  { %v1037_v22 = vpop.eup %1036 }
 0x586   :  { %v850_v23 = vmul.f32 %v1035_v17, %v849_v21  ;;  %v856_v24 = vmul.f32 %v1037_v22, %v844_v14  ;;  %vm862_vm8 = vweird.f32 %v1037_v22 }
 0x587   :  { %vm863_vm10 = vmor %vm861_vm9, %vm862_vm8 }
 0x588   :  { %v854_v4 = vsel %vm853_vm7, %v1035_v17, %v850_v23  ;;  %v857_v27 = vmul.f32 %v1037_v22, %v856_v24 }
 0x589   :  { %v865_v29 = vmul.f32 %v854_v4, %v841_v25 }
 0x58a   :  { %v858_v30 = vmul.f32 0.5, %v857_v27 }
 0x58b   :  { %v868_v31 = vmul.f32 %v867_v26, %v865_v29 }
 0x58c   :  { %v859_v32 = vsub.f32 1.5, %v858_v30 }
 0x58d   :  { %v871_v33 = vadd.f32 %v870_v28, %v868_v31 }
 0x58e   :  { %v860_v34 = vmul.f32 %v1037_v22, %v859_v32 }
 0x58f   :  { %873 = vst.msk [vmem:[%s1282_s8] sm:$0xff] %vm52_vm0, %v871_v33 }
 0x590   :  { %v864_v36 = vsel %vm863_vm10, %v1037_v22, %v860_v34 }
 0x591   :  { %v866_v37 = vmul.f32 %v864_v36, %v842_v35 }
 0x593   :  { %v869_v38 = vmul.f32 %v867_v26, %v866_v37 }
 0x595   :  { %v872_v39 = vadd.f32 %v870_v28, %v869_v38 }
 0x597   :  { %874 = vst.msk [vmem:[%s1282_s8 + $0x8] sm:$0xff] %vm52_vm0, %v872_v39 }

</bundles_post_ra>
